<compile_context>
chip_gen: v5e
topology: v5e:2x2
jax: 0.10.0
libtpu: 0.0.40
codegen_flags: <defaults>
</compile_context>

<pallas_src>
import functools

import jax
import jax.numpy as jnp
from jax.experimental import pallas as pl
from jax.experimental.pallas import tpu as pltpu

# -----------------------------------------------------------------------------
# Model dims (from AutoEncoder.__init__)
# -----------------------------------------------------------------------------
F_IN = 37     # conv1 in
F_H1 = 30     # conv1 out / conv2 in
F_LAT = 25    # conv2 out / unconv1 in
F_H2 = 30     # unconv1 out / unconv2 in
F_OUT = 37    # unconv2 out

FPAD = 128    # padded feature width (lane dim) for every layer
NALIGN = 128  # node-dim alignment: lane-dense adjacency, unmasked MXU passes


# -----------------------------------------------------------------------------
# Pallas kernel: whole 4-layer GCN forward for ONE graph of the batch
# (grid axis 0 = graph index, "parallel").
# -----------------------------------------------------------------------------
def gae_kernel(a_ref, x_ref,
               w1_ref, b1_ref, w2_ref, b2_ref,
               w3_ref, b3_ref, w4_ref, b4_ref,
               o_ref):
    # Per-grid-step views (batch dim squeezed away by the BlockSpecs):
    #   a_ref : [Np, Np]   f32  normalized adjacency (kept f32: reused by all
    #                           4 layers and accuracy-critical)
    #   x_ref : [Np, FPAD] bf16 node features
    #   wK    : [FPAD, FPAD] bf16 ; bK : [1, FPAD] f32
    a = a_ref[...]
    h = x_ref[...]

    def gcn_layer(h_bf16, w_ref, b_ref):
        # Transform first (X @ W, bf16 operands, f32 MXU accumulation), then
        # aggregate with the f32 adjacency (f32 matmul) and add the f32 bias.
        xw = jnp.dot(h_bf16, w_ref[...], preferred_element_type=jnp.float32)
        agg = jnp.dot(a, xw, preferred_element_type=jnp.float32)
        return agg + b_ref[...]

    # encoder
    h = jnp.maximum(gcn_layer(h, w1_ref, b1_ref), 0.0).astype(jnp.bfloat16)
    h = gcn_layer(h, w2_ref, b2_ref).astype(jnp.bfloat16)
    # decoder
    h = jnp.maximum(gcn_layer(h, w3_ref, b3_ref), 0.0).astype(jnp.bfloat16)
    # TODO(synk): emit bf16 here (and in out_shape) if downstream tolerates it;
    # halves output writeback bytes once batch / N grow.
    o_ref[...] = gcn_layer(h, w4_ref, b4_ref)            # f32 output


# -----------------------------------------------------------------------------
# Glue: normalized adjacency, padding, parameter init, pallas_call wrapper.
# -----------------------------------------------------------------------------
def normalized_adjacency(edge_index, num_nodes):
    """Dense D^{-1/2}(A+I)D^{-1/2}, A[i,j]=1 iff edge j->i (PyG convention).

    Note: duplicate edges / pre-existing self loops diverge from PyG's
    gcn_norm edge cases; fine for clean simple graphs like the test rings.
    """
    src, dst = edge_index[0], edge_index[1]
    a = jnp.zeros((num_nodes, num_nodes), jnp.float32)
    a = a.at[dst, src].set(1.0)                      # messages flow src -> dst
    a = a + jnp.eye(num_nodes, dtype=jnp.float32)    # add self loops
    deg = jnp.sum(a, axis=1)                         # in-degree incl. self loop
    dinv = jnp.where(deg > 0, 1.0 / jnp.sqrt(deg), 0.0)
    return a * dinv[:, None] * dinv[None, :]


def _pad2(x, rows, cols, dtype):
    out = jnp.zeros((rows, cols), dtype)
    return out.at[:x.shape[0], :x.shape[1]].set(x.astype(dtype))


def init_params(key):
    """Deterministic glorot-uniform weights + zero biases for the 4 GCN layers."""
    dims = [(F_IN, F_H1), (F_H1, F_LAT), (F_LAT, F_H2), (F_H2, F_OUT)]
    params = []
    for i, (fi, fo) in enumerate(dims):
        k = jax.random.fold_in(key, i)
        limit = jnp.sqrt(6.0 / (fi + fo))
        w = jax.random.uniform(k, (fi, fo), jnp.float32, -limit, limit)
        b = jnp.zeros((fo,), jnp.float32)
        params.append((w, b))
    return params


def prepare_params(params):
    """Pad weights/biases ONCE at init (hoisted out of the forward path).

    Weights -> [FPAD, FPAD] bf16 (MXU operands); biases -> [1, FPAD] f32.
    NOTE: correctness of the padded output columns relies on this padding
    being exactly zero.
    """
    padded = []
    for w, b in params:
        padded.append(_pad2(w, FPAD, FPAD, jnp.bfloat16))
        padded.append(_pad2(b[None, :], 1, FPAD, jnp.float32))
    return tuple(padded)


def prepare_graph_batch(x_list, edge_index_list, num_nodes):
    """Build the batch of 128-aligned normalized adjacencies (f32, accuracy-
    critical and reused 4x per forward) + padded bf16 features once per batch
    (hoisted out of the per-forward path)."""
    n_pad = ((num_nodes + NALIGN - 1) // NALIGN) * NALIGN
    a_b, x_b = [], []
    for x, ei in zip(x_list, edge_index_list):
        a_hat = normalized_adjacency(ei, num_nodes)
        a_b.append(_pad2(a_hat, n_pad, n_pad, jnp.float32))
        x_b.append(_pad2(x, n_pad, FPAD, jnp.bfloat16))
    return jnp.stack(a_b), jnp.stack(x_b)


@functools.partial(jax.jit, static_argnames=("num_nodes",))
def autoencoder_forward(a_pad, x_pad, padded_params, num_nodes):
    batch, n_pad, _ = a_pad.shape

    # ---- per-grid-step footprint & generation-aware VMEM budget ------------
    blk_bytes = (n_pad * n_pad * 4          # A block (f32)
                 + n_pad * FPAD * 2         # X block (bf16)
                 + n_pad * FPAD * 4)        # out block (f32)
    param_bytes = sum(int(p.size) * p.dtype.itemsize for p in padded_params)
    per_step = blk_bytes + param_bytes
    try:
        vmem_cap = int(pltpu.get_tpu_info().vmem_capacity_bytes)
    except Exception:
        vmem_cap = 64 << 20                 # conservative fallback (v7x size)
    # Leave headroom for compiler-internal scratch; never claim the full chip.
    ceiling = max(32 << 20, vmem_cap - (12 << 20))   # ~52MiB v7x, ~116MiB v5e/v6e
    vmem_limit = int(max(16 << 20, min(2 * per_step + (4 << 20), ceiling)))

    # ---- cost estimate: 4 layers x (transform + aggregation) per graph -----
    flops = batch * 4 * 2 * (n_pad * FPAD * FPAD + n_pad * n_pad * FPAD)
    bytes_accessed = (int(a_pad.size) * 4 + int(x_pad.size) * 2
                      + param_bytes + batch * n_pad * FPAD * 4)
    cost = pl.CostEstimate(flops=flops, transcendentals=0,
                           bytes_accessed=bytes_accessed)

    w_spec = pl.BlockSpec((FPAD, FPAD), lambda b: (0, 0))
    b_spec = pl.BlockSpec((1, FPAD), lambda b: (0, 0))

    out = pl.pallas_call(
        gae_kernel,
        grid=(batch,),
        in_specs=[
            pl.BlockSpec((None, n_pad, n_pad), lambda b: (b, 0, 0)),   # A_hat[b]
            pl.BlockSpec((None, n_pad, FPAD), lambda b: (b, 0, 0)),    # X[b]
            w_spec, b_spec, w_spec, b_spec, w_spec, b_spec, w_spec, b_spec,
        ],
        out_specs=pl.BlockSpec((None, n_pad, FPAD), lambda b: (b, 0, 0)),
        out_shape=jax.ShapeDtypeStruct((batch, n_pad, FPAD), jnp.float32),
        compiler_params=pltpu.CompilerParams(
            dimension_semantics=("parallel",),     # v7x megacore over graphs
            vmem_limit_bytes=vmem_limit),
        cost_estimate=cost,
    )(a_pad, x_pad, *padded_params)

    return out[:, :num_nodes, :F_OUT]


def autoencoder_reference(x, edge_index, params, num_nodes):
    """Pure-JAX f32 reference mirroring the PyTorch/PyG forward (one graph)."""
    a_hat = normalized_adjacency(edge_index, num_nodes)
    (w1, b1), (w2, b2), (w3, b3), (w4, b4) = params
    h = jax.nn.relu(a_hat @ (x @ w1) + b1)
    h = a_hat @ (h @ w2) + b2
    h = jax.nn.relu(a_hat @ (h @ w3) + b3)
    return a_hat @ (h @ w4) + b4


if __name__ == "__main__":
    key = jax.random.PRNGKey(0)
    k_x, k_w = jax.random.split(key)

    num_nodes = 16
    batch = 8

    # Batch of deterministic graphs: graph b is an undirected circulant ring
    # with stride 1 + (b % 7): edges i <-> (i + stride) mod N, shape [2, 2N].
    idx = jnp.arange(num_nodes)
    xs, edges = [], []
    for b in range(batch):
        kb = jax.random.fold_in(k_x, b)
        xs.append(jax.random.normal(kb, (num_nodes, F_IN), jnp.float32))
        stride = 1 + (b % (num_nodes // 2 - 1))
        nxt = (idx + stride) % num_nodes
        edges.append(jnp.stack(
            [jnp.concatenate([idx, nxt]), jnp.concatenate([nxt, idx])],
            axis=0).astype(jnp.int32))

    params = init_params(k_w)
    padded_params = prepare_params(params)                     # once at init
    a_pad, x_pad = prepare_graph_batch(xs, edges, num_nodes)   # once per batch

    out = autoencoder_forward(a_pad, x_pad, padded_params, num_nodes)
    out = jax.block_until_ready(out)

    ref = jnp.stack([autoencoder_reference(xs[b], edges[b], params, num_nodes)
                     for b in range(batch)])

    assert out.shape == (batch, num_nodes, F_OUT), out.shape
    # f32 adjacency + f32 aggregation tightened accuracy vs the all-bf16
    # version (was 5e-2); bf16 X@W operands are the remaining error source.
    max_err = float(jnp.max(jnp.abs(out - ref)))
    assert jnp.allclose(out, ref, atol=3e-2, rtol=3e-2), max_err

    print("KERNEL_OK")
</pallas_src>

<mosaic_0001>
module attributes {stable_mosaic.version = 11 : i64} {
  func.func @gae_kernel(%arg0: i32, %arg1: memref<1x128x128xf32, #tpu.memory_space<vmem>>, %arg2: memref<1x128x128xbf16, #tpu.memory_space<vmem>>, %arg3: memref<128x128xbf16, #tpu.memory_space<vmem>>, %arg4: memref<1x128xf32, #tpu.memory_space<vmem>>, %arg5: memref<128x128xbf16, #tpu.memory_space<vmem>>, %arg6: memref<1x128xf32, #tpu.memory_space<vmem>>, %arg7: memref<128x128xbf16, #tpu.memory_space<vmem>>, %arg8: memref<1x128xf32, #tpu.memory_space<vmem>>, %arg9: memref<128x128xbf16, #tpu.memory_space<vmem>>, %arg10: memref<1x128xf32, #tpu.memory_space<vmem>>, %arg11: memref<1x128x128xf32, #tpu.memory_space<vmem>>) attributes {dimension_semantics = [#tpu.dimension_semantics<parallel>], iteration_bounds = array<i64: 8>, scalar_prefetch = 0 : i64, scratch_operands = 0 : i64, tpu.core_type = #tpu.core_type<tc>, window_params = [{transform_indices = @transform_0, window_bounds = array<i64: 1, 128, 128>}, {transform_indices = @transform_1, window_bounds = array<i64: 1, 128, 128>}, {pipeline_mode = #tpu.pipeline_mode<synchronous>, transform_indices = @transform_2, window_bounds = array<i64: 128, 128>}, {pipeline_mode = #tpu.pipeline_mode<synchronous>, transform_indices = @transform_3, window_bounds = array<i64: 1, 128>}, {pipeline_mode = #tpu.pipeline_mode<synchronous>, transform_indices = @transform_4, window_bounds = array<i64: 128, 128>}, {pipeline_mode = #tpu.pipeline_mode<synchronous>, transform_indices = @transform_5, window_bounds = array<i64: 1, 128>}, {pipeline_mode = #tpu.pipeline_mode<synchronous>, transform_indices = @transform_6, window_bounds = array<i64: 128, 128>}, {pipeline_mode = #tpu.pipeline_mode<synchronous>, transform_indices = @transform_7, window_bounds = array<i64: 1, 128>}, {pipeline_mode = #tpu.pipeline_mode<synchronous>, transform_indices = @transform_8, window_bounds = array<i64: 128, 128>}, {pipeline_mode = #tpu.pipeline_mode<synchronous>, transform_indices = @transform_9, window_bounds = array<i64: 1, 128>}, {transform_indices = @transform_10, window_bounds = array<i64: 1, 128, 128>}]} {
    %c0 = arith.constant 0 : index
    %c0_0 = arith.constant 0 : index
    %c0_1 = arith.constant 0 : index
    %0 = vector.load %arg1[%c0, %c0_0, %c0_1] : memref<1x128x128xf32, #tpu.memory_space<vmem>>, vector<1x128x128xf32>
    %1 = vector.shape_cast %0 : vector<1x128x128xf32> to vector<128x128xf32>
    %c0_2 = arith.constant 0 : index
    %c0_3 = arith.constant 0 : index
    %c0_4 = arith.constant 0 : index
    %2 = vector.load %arg2[%c0_2, %c0_3, %c0_4] : memref<1x128x128xbf16, #tpu.memory_space<vmem>>, vector<1x128x128xbf16>
    %3 = vector.shape_cast %2 : vector<1x128x128xbf16> to vector<128x128xbf16>
    %c0_5 = arith.constant 0 : index
    %c0_6 = arith.constant 0 : index
    %4 = vector.load %arg3[%c0_5, %c0_6] : memref<128x128xbf16, #tpu.memory_space<vmem>>, vector<128x128xbf16>
    %cst = arith.constant dense<0.000000e+00> : vector<128x128xf32>
    %5 = tpu.matmul %3, %4, %cst {dimension_numbers = #tpu.dot_dimension_numbers<[1], [0], [0], [1], [0, 0, 1, 1], [], []>} : vector<128x128xbf16>, vector<128x128xbf16>, vector<128x128xf32> -> vector<128x128xf32>
    %cst_7 = arith.constant dense<0.000000e+00> : vector<128x128xf32>
    %6 = tpu.matmul %1, %5, %cst_7 {dimension_numbers = #tpu.dot_dimension_numbers<[1], [0], [0], [1], [0, 0, 1, 1], [], []>} : vector<128x128xf32>, vector<128x128xf32>, vector<128x128xf32> -> vector<128x128xf32>
    %c0_8 = arith.constant 0 : index
    %c0_9 = arith.constant 0 : index
    %7 = vector.load %arg4[%c0_8, %c0_9] : memref<1x128xf32, #tpu.memory_space<vmem>>, vector<1x128xf32>
    %8 = vector.broadcast %7 : vector<1x128xf32> to vector<128x128xf32>
    %9 = arith.addf %6, %8 : vector<128x128xf32>
    %cst_10 = arith.constant 0.000000e+00 : f32
    %10 = vector.broadcast %cst_10 : f32 to vector<128x128xf32>
    %11 = arith.maximumf %9, %10 : vector<128x128xf32>
    %12 = arith.truncf %11 : vector<128x128xf32> to vector<128x128xbf16>
    %c0_11 = arith.constant 0 : index
    %c0_12 = arith.constant 0 : index
    %13 = vector.load %arg5[%c0_11, %c0_12] : memref<128x128xbf16, #tpu.memory_space<vmem>>, vector<128x128xbf16>
    %cst_13 = arith.constant dense<0.000000e+00> : vector<128x128xf32>
    %14 = tpu.matmul %12, %13, %cst_13 {dimension_numbers = #tpu.dot_dimension_numbers<[1], [0], [0], [1], [0, 0, 1, 1], [], []>} : vector<128x128xbf16>, vector<128x128xbf16>, vector<128x128xf32> -> vector<128x128xf32>
    %cst_14 = arith.constant dense<0.000000e+00> : vector<128x128xf32>
    %15 = tpu.matmul %1, %14, %cst_14 {dimension_numbers = #tpu.dot_dimension_numbers<[1], [0], [0], [1], [0, 0, 1, 1], [], []>} : vector<128x128xf32>, vector<128x128xf32>, vector<128x128xf32> -> vector<128x128xf32>
    %c0_15 = arith.constant 0 : index
    %c0_16 = arith.constant 0 : index
    %16 = vector.load %arg6[%c0_15, %c0_16] : memref<1x128xf32, #tpu.memory_space<vmem>>, vector<1x128xf32>
    %17 = vector.broadcast %16 : vector<1x128xf32> to vector<128x128xf32>
    %18 = arith.addf %15, %17 : vector<128x128xf32>
    %19 = arith.truncf %18 : vector<128x128xf32> to vector<128x128xbf16>
    %c0_17 = arith.constant 0 : index
    %c0_18 = arith.constant 0 : index
    %20 = vector.load %arg7[%c0_17, %c0_18] : memref<128x128xbf16, #tpu.memory_space<vmem>>, vector<128x128xbf16>
    %cst_19 = arith.constant dense<0.000000e+00> : vector<128x128xf32>
    %21 = tpu.matmul %19, %20, %cst_19 {dimension_numbers = #tpu.dot_dimension_numbers<[1], [0], [0], [1], [0, 0, 1, 1], [], []>} : vector<128x128xbf16>, vector<128x128xbf16>, vector<128x128xf32> -> vector<128x128xf32>
    %cst_20 = arith.constant dense<0.000000e+00> : vector<128x128xf32>
    %22 = tpu.matmul %1, %21, %cst_20 {dimension_numbers = #tpu.dot_dimension_numbers<[1], [0], [0], [1], [0, 0, 1, 1], [], []>} : vector<128x128xf32>, vector<128x128xf32>, vector<128x128xf32> -> vector<128x128xf32>
    %c0_21 = arith.constant 0 : index
    %c0_22 = arith.constant 0 : index
    %23 = vector.load %arg8[%c0_21, %c0_22] : memref<1x128xf32, #tpu.memory_space<vmem>>, vector<1x128xf32>
    %24 = vector.broadcast %23 : vector<1x128xf32> to vector<128x128xf32>
    %25 = arith.addf %22, %24 : vector<128x128xf32>
    %cst_23 = arith.constant 0.000000e+00 : f32
    %26 = vector.broadcast %cst_23 : f32 to vector<128x128xf32>
    %27 = arith.maximumf %25, %26 : vector<128x128xf32>
    %28 = arith.truncf %27 : vector<128x128xf32> to vector<128x128xbf16>
    %c0_24 = arith.constant 0 : index
    %c0_25 = arith.constant 0 : index
    %29 = vector.load %arg9[%c0_24, %c0_25] : memref<128x128xbf16, #tpu.memory_space<vmem>>, vector<128x128xbf16>
    %cst_26 = arith.constant dense<0.000000e+00> : vector<128x128xf32>
    %30 = tpu.matmul %28, %29, %cst_26 {dimension_numbers = #tpu.dot_dimension_numbers<[1], [0], [0], [1], [0, 0, 1, 1], [], []>} : vector<128x128xbf16>, vector<128x128xbf16>, vector<128x128xf32> -> vector<128x128xf32>
    %cst_27 = arith.constant dense<0.000000e+00> : vector<128x128xf32>
    %31 = tpu.matmul %1, %30, %cst_27 {dimension_numbers = #tpu.dot_dimension_numbers<[1], [0], [0], [1], [0, 0, 1, 1], [], []>} : vector<128x128xf32>, vector<128x128xf32>, vector<128x128xf32> -> vector<128x128xf32>
    %c0_28 = arith.constant 0 : index
    %c0_29 = arith.constant 0 : index
    %32 = vector.load %arg10[%c0_28, %c0_29] : memref<1x128xf32, #tpu.memory_space<vmem>>, vector<1x128xf32>
    %33 = vector.broadcast %32 : vector<1x128xf32> to vector<128x128xf32>
    %34 = arith.addf %31, %33 : vector<128x128xf32>
    %c0_30 = arith.constant 0 : index
    %c0_31 = arith.constant 0 : index
    %c0_32 = arith.constant 0 : index
    %35 = vector.load %arg11[%c0_30, %c0_31, %c0_32] : memref<1x128x128xf32, #tpu.memory_space<vmem>>, vector<1x128x128xf32>
    %36 = vector.shape_cast %35 : vector<1x128x128xf32> to vector<128x128xf32>
    %37 = vector.shape_cast %34 : vector<128x128xf32> to vector<1x128x128xf32>
    tpu.vector_store %arg11[%c0_30, %c0_31, %c0_32], %37 {strides = array<i32>} : memref<1x128x128xf32, #tpu.memory_space<vmem>>, vector<1x128x128xf32>,
    return
  }
  func.func @transform_0(%arg0: i32) -> (i32, i32, i32) {
    %c0_i32 = arith.constant 0 : i32
    %c0_i32_0 = arith.constant 0 : i32
    %c0_i32_1 = arith.constant 0 : i32
    return %arg0, %c0_i32, %c0_i32_0 : i32, i32, i32
  }
  func.func @transform_1(%arg0: i32) -> (i32, i32, i32) {
    %c0_i32 = arith.constant 0 : i32
    %c0_i32_0 = arith.constant 0 : i32
    %c0_i32_1 = arith.constant 0 : i32
    return %arg0, %c0_i32, %c0_i32_0 : i32, i32, i32
  }
  func.func @transform_2(%arg0: i32) -> (i32, i32) {
    %c0_i32 = arith.constant 0 : i32
    %c0_i32_0 = arith.constant 0 : i32
    %c0_i32_1 = arith.constant 0 : i32
    return %c0_i32, %c0_i32_0 : i32, i32
  }
  func.func @transform_3(%arg0: i32) -> (i32, i32) {
    %c0_i32 = arith.constant 0 : i32
    %c0_i32_0 = arith.constant 0 : i32
    %c0_i32_1 = arith.constant 0 : i32
    return %c0_i32, %c0_i32_0 : i32, i32
  }
  func.func @transform_4(%arg0: i32) -> (i32, i32) {
    %c0_i32 = arith.constant 0 : i32
    %c0_i32_0 = arith.constant 0 : i32
    %c0_i32_1 = arith.constant 0 : i32
    return %c0_i32, %c0_i32_0 : i32, i32
  }
  func.func @transform_5(%arg0: i32) -> (i32, i32) {
    %c0_i32 = arith.constant 0 : i32
    %c0_i32_0 = arith.constant 0 : i32
    %c0_i32_1 = arith.constant 0 : i32
    return %c0_i32, %c0_i32_0 : i32, i32
  }
  func.func @transform_6(%arg0: i32) -> (i32, i32) {
    %c0_i32 = arith.constant 0 : i32
    %c0_i32_0 = arith.constant 0 : i32
    %c0_i32_1 = arith.constant 0 : i32
    return %c0_i32, %c0_i32_0 : i32, i32
  }
  func.func @transform_7(%arg0: i32) -> (i32, i32) {
    %c0_i32 = arith.constant 0 : i32
    %c0_i32_0 = arith.constant 0 : i32
    %c0_i32_1 = arith.constant 0 : i32
    return %c0_i32, %c0_i32_0 : i32, i32
  }
  func.func @transform_8(%arg0: i32) -> (i32, i32) {
    %c0_i32 = arith.constant 0 : i32
    %c0_i32_0 = arith.constant 0 : i32
    %c0_i32_1 = arith.constant 0 : i32
    return %c0_i32, %c0_i32_0 : i32, i32
  }
  func.func @transform_9(%arg0: i32) -> (i32, i32) {
    %c0_i32 = arith.constant 0 : i32
    %c0_i32_0 = arith.constant 0 : i32
    %c0_i32_1 = arith.constant 0 : i32
    return %c0_i32, %c0_i32_0 : i32, i32
  }
  func.func @transform_10(%arg0: i32) -> (i32, i32, i32) {
    %c0_i32 = arith.constant 0 : i32
    %c0_i32_0 = arith.constant 0 : i32
    %c0_i32_1 = arith.constant 0 : i32
    return %arg0, %c0_i32, %c0_i32_0 : i32, i32, i32
  }
}

</mosaic_0001>

<bundles_post_ra>
// kernel: autoencoder_forward.1
= control target key start
LH: loop header
LB: loop body
LE: loop exit
PB: predicated region body
PF: predicated region fallthrough
CT: control target
= control target key end

     0   :  { %s2443_s0 = inlined_call_operand.hbm [shape: f32[8,128,128], index: 0, kind: input, shape index: {}]   ;;  %s2444_s1 = inlined_call_operand.hbm [shape: bf16[8,128,128], index: 1, kind: input, shape index: {}]   ;;  %s2445_s2 = inlined_call_operand.hbm [shape: bf16[128,128], index: 2, kind: input, shape index: {}]   ;;  %s2446_s3 = inlined_call_operand.vmem [shape: f32[1,128], index: 3, kind: input, shape index: {}]   ;;  %s2447_s4 = inlined_call_operand.hbm [shape: bf16[128,128], index: 4, kind: input, shape index: {}]   ;;  %s2448_s5 = inlined_call_operand.vmem [shape: f32[1,128], index: 5, kind: input, shape index: {}]   ;;  %s2449_s6 = inlined_call_operand.hbm [shape: bf16[128,128], index: 6, kind: input, shape index: {}]   ;;  %s2450_s7 = inlined_call_operand.vmem [shape: f32[1,128], index: 7, kind: input, shape index: {}]   ;;  %s2451_s8 = inlined_call_operand.hbm [shape: bf16[128,128], index: 8, kind: input, shape index: {}]   ;;  %s2452_s9 = inlined_call_operand.vmem [shape: f32[1,128], index: 9, kind: input, shape index: {}]   ;;  %s2453_s10 = inlined_call_operand.vmem [shape: f32[8,128,128], index: 10, kind: output, shape index: {}]  }
   0x1   :  { %2457 = sst [smem:[#allocation19_spill]] %s2443_s0 }
   0x2   :  { %2458 = sst [smem:[#allocation20_spill]] %s2445_s2 }
   0x3   :  { %2459 = sst [smem:[#allocation21_spill]] %s2447_s4 }
   0x4   :  { %2460 = sst [smem:[#allocation22_spill]] %s2449_s6 }
   0x5   :  { %2461 = sst [smem:[#allocation23_spill]] %s2451_s8 }
   0x6   :  { %15 = vsyncpa [#allocation3], 0 }
   0x7   :  { %17 = vsyncpa [#allocation3 + $0x1], 0 }
   0x8   :  { %18 = vsyncpa [#allocation5], 0 }
   0x9   :  { %20 = vsyncpa [#allocation5 + $0x1], 0 }
   0xa   :  { %21 = vsyncpa [#allocation8], 0 }
   0xb   :  { %22 = vsyncpa [#allocation11], 0  ;;  %s2113_s13 = smov 0   ;;  %s2115_s14 = smov 0  }
   0xc   :  { %s2117_s15 = smov 0   ;;  %s2119_s16 = smov 0  }
   0xd LB: > { %2462 = sst [smem:[#allocation17_spill]] %s2044_s15  ;;  %s2132_s17 = sadd.s32 4294967295, %s2048_s16   ;;  %s2048_s16 = sphi %s2119_s16, %s2479_s16   ;;  %s2044_s15 = sphi %s2117_s15, %s2476_s15   ;;  %s2040_s14 = sphi %s2115_s14, %s2478_s14   ;;  %s2036_s13 = sphi %s2113_s13, %s2477_s13  }
   0xe   : > { %p48_p0 = scmp.ne.s32.totalorder %s2040_s14, %s2036_s13  ;;  %p49_p1 = scmp.eq.s32.totalorder %s2132_s17, 0 }
   0xf   : > { %p1499_p2 = scmp.ge.s32.totalorder %s2048_s16, 1  ;;  %p279_p3 = scmp.lt.s32.totalorder %s2048_s16, 9 }
  0x10   : > { %p2140_p4 = por %p49_p1, %p48_p0  ;;  %s2464_s2 = sld [smem:[#allocation20_spill]] }
  0x11   : > { %p2147_p5 = pnand %p1499_p2, %p279_p3  ;;  %s2050_s23 = smov [#allocation6]  }
  0x12   : > { %s292_s24 = sshll.u32 %s2050_s23, 4  ;;  %s2467_s4 = sld [smem:[#allocation21_spill]]  ;;  %s293_s24 = int_to_ptr.vmem [resolvable:$true] %s292_s24 }
  0x13   : > { %p1745_p6 = pneg %p2147_p5  ;;  %s2454_s29 = smov 64  }
  0x14   : > { %s2455_s30 = smov 4   ;;  %s2053_s11 = smov [#allocation7]  }
  0x15   : > { %p2155_p7 = pnand %p1745_p6, %p49_p1  ;;  %s309_s12 = sshll.u32 %s2053_s11, 4  ;;  %s310_s12 = int_to_ptr.vmem [resolvable:$true] %s309_s12 }
  0x16   : > { %s290_s21 = sshll.u32 %s2464_s2, 4  ;;  %s2468_s6 = sld [smem:[#allocation22_spill]]  ;;  %s291_s21 = int_to_ptr.hbm [resolvable:$true] %s290_s21 }
  0x17   : > { %1748 = dma.hbm_to_vmem [thread:$0]  (!%p2155_p7), %s291_s21, 1024, %s293_s24, [#allocation5], %s2454_s29, %s2454_s29, %s2455_s30  }
  0x18   : > { %s307_s28 = sshll.u32 %s2467_s4, 4  ;;  %s2469_s8 = sld [smem:[#allocation23_spill]]  ;;  %s308_s28 = int_to_ptr.hbm [resolvable:$true] %s307_s28 }
  0x19   : > { %1751 = dma.hbm_to_vmem [thread:$0]  (!%p2155_p7), %s308_s28, 1024, %s310_s12, [#allocation8], %s2454_s29, %s2454_s29, %s2455_s30  }
  0x1a   : > { %s2054_s26 = smov [#allocation9]   ;;  %s2055_s11 = smov [#allocation10]  }
  0x1b   : > { %s326_s27 = sshll.u32 %s2054_s26, 4  ;;  %s343_s28 = sshll.u32 %s2055_s11, 4  ;;  %s327_s27 = int_to_ptr.vmem [resolvable:$true] %s326_s27  ;;  %s344_s28 = int_to_ptr.vmem [resolvable:$true] %s343_s28 }
  0x1c   : > { %s324_s20 = sshll.u32 %s2468_s6, 4  ;;  %s2189_s12 = sadd.s32 1, %s2048_s16   ;;  %s325_s20 = int_to_ptr.hbm [resolvable:$true] %s324_s20 }
  0x1d   : > { %1754 = dma.hbm_to_vmem [thread:$0]  (!%p2155_p7), %s325_s20, 1024, %s327_s27, [#allocation8], %s2454_s29, %s2454_s29, %s2455_s30  }
  0x1e   : > { %s341_s24 = sshll.u32 %s2469_s8, 4  ;;  %s35_s13 = sadd.s32 1, %s2044_s15  ;;  %s342_s24 = int_to_ptr.hbm [resolvable:$true] %s341_s24 }
  0x1f   : > { %1757 = dma.hbm_to_vmem [thread:$0]  (!%p2155_p7), %s342_s24, 1024, %s344_s28, [#allocation11], %s2454_s29, %s2454_s29, %s2455_s30  }
  0x20   : > { %s32_s19 = ssub.s32 %s2048_s16, %s2189_s12  ;;  %p42_p8 = scmp.ne.s32.totalorder %s2044_s15, %s2040_s14 }
  0x21   : > { %p33_p9 = scmp.eq.s32.totalorder %s32_s19, 0  ;;  %p43_p10 = scmp.eq.s32.totalorder %s2048_s16, 0 }
  0x22   : > { %p1769_p11 = scmp.lt.s32.totalorder %s2048_s16, 8  ;;  %s2199_s20 = sand.u32 1, %s2044_s15  }
  0x23   : > { %s2202_s21 = scalar_select %p33_p9, %s2044_s15, %s35_s13  }
  0x24   : > { %p44_p12 = por %p43_p10, %p42_p8  ;;  %s1505_s25 = sshll.u32 %s2199_s20, 7 }
  0x25   : > { %2470 = sst [smem:[#allocation18_spill]] %s2202_s21  ;;  %s1682_s23 = sshll.u32 %s2048_s16, 7 }
  0x26   : > { %s2471_s0 = sld [smem:[#allocation19_spill]]  ;;  %s364_s28 = scalar_lea.vmem [#allocation2], %s1505_s25 }
  0x27   : > { %s372_s29 = sshll.u32 %s364_s28, 4  ;;  %p2209_p13 = pnand %p1769_p11, %p44_p12  ;;  %s373_s29 = int_to_ptr.vmem [resolvable:$true] %s372_s29 }
  0x28   : > { %s382_s13 = sand.u32 1, %s2048_s16   ;;  %s361_s30 = scalar_lea.sflag [#allocation3], %s2199_s20 }
  0x29   : > { %p1942_p2 = pneg %p2209_p13 }
  0x2c   : > { %s369_s27 = scalar_lea.hbm %s2471_s0, %s1682_s23  ;;  %s1945_s24 = scalar_lea.hbm %s2471_s0, 1024 }
  0x2d   : > { %s370_s11 = sshll.u32 %s369_s27, 4  ;;  %s371_s11 = int_to_ptr.hbm [resolvable:$true] %s370_s11 }
  0x2e   : > { %s1938_s2 = sshra.s32 %s371_s11, 4  ;;  %s1939_s2 = int_to_ptr.hbm [resolvable:$true] %s1938_s2 }
  0x2f   : > { %s1940_s4 = scalar_lea.hbm %s1939_s2, 128  ;;  %p1946_p7 = scmp.lt.s32.totalorder %s1939_s2, %s2471_s0 }
  0x30   : > { %p1941_p0 = scmp.ne.s32.totalorder %s1939_s2, %s1940_s4  ;;  %p1947_p8 = scmp.lt.s32.totalorder %s1945_s24, %s1940_s4 }
  0x32   : > { %p1943_p3 = pnand %p1942_p2, %p1941_p0  ;;  %p1948_p9 = por %p1947_p8, %p1946_p7 }
  0x34   : > { %p1944_p6 = pneg %p1943_p3 }
  0x36   : > { %p1949_p10 = pnand %p1948_p9, %p1944_p6 }
  0x38   : > { %1952 = shalt.err (!%p1949_p10)
}
  0x39   : > { %s2056_s28 = smov 128   ;;  %s2057_s6 = smov 8  }
  0x3a   : > { %1761 = dma.hbm_to_vmem [thread:$0]  (!%p2209_p13), %s371_s11, 2048, %s373_s29, %s361_s30, %s2056_s28, %s2056_s28, %s2057_s6  }
  0x3b   : > { %s1508_s8 = sshll.u32 %s2199_s20, 6  ;;  %s1683_s21 = sshll.u32 %s2048_s16, 6 }
  0x3c   : > { %s391_s15 = scalar_lea.hbm %s2444_s1, %s1683_s21  ;;  %s386_s2 = scalar_lea.vmem [#allocation4], %s1508_s8 }
  0x3d   : > { %s392_s26 = sshll.u32 %s391_s15, 4  ;;  %s394_s4 = sshll.u32 %s386_s2, 4  ;;  %s393_s26 = int_to_ptr.hbm [resolvable:$true] %s392_s26  ;;  %s395_s4 = int_to_ptr.vmem [resolvable:$true] %s394_s4 }
  0x3e   : > { %s383_s24 = scalar_lea.sflag [#allocation5], %s382_s13  ;;  %s1968_s27 = sshra.s32 %s393_s26, 4  ;;  %s1969_s27 = int_to_ptr.hbm [resolvable:$true] %s1968_s27 }
  0x3f   : > { %s1970_s0 = scalar_lea.hbm %s1969_s27, 64  ;;  %s1975_s29 = scalar_lea.hbm %s2444_s1, 512 }
  0x40   : > { %p1971_p11 = scmp.ne.s32.totalorder %s1969_s27, %s1970_s0  ;;  %p1976_p3 = scmp.lt.s32.totalorder %s1969_s27, %s2444_s1 }
  0x41   : > { %p1977_p6 = scmp.lt.s32.totalorder %s1975_s29, %s1970_s0 }
  0x42   : > { %p1973_p12 = pnand %p1971_p11, %p1942_p2 }
  0x43   : > { %p1978_p7 = por %p1977_p6, %p1976_p3 }
  0x44   : > { %p1974_p0 = pneg %p1973_p12 }
  0x46   : > { %p1979_p8 = pnand %p1978_p7, %p1974_p0 }
  0x48   : > { %1982 = shalt.err (!%p1979_p8)
}
  0x49   : > { %s2473_s8 = smov 4   ;;  %s2474_s15 = smov 64  }
  0x4a   : > { %1764 = dma.hbm_to_vmem [thread:$0]  (!%p2209_p13), %s393_s26, 1024, %s395_s4, %s383_s24, %s2474_s15, %s2474_s15, %s2473_s8  }
  0x4b   : > { %406 = sbr.rel (%p2147_p5) target bundleno = 1921 (0x781), region = 60  ;;  %s408_s21 = sand.u32 (!%p2147_p5), 1, %s2040_s14  }
  0x4c   : > { %s1512_s11 = sshll.u32 (!%p2147_p5), %s408_s21, 7  ;;  %s409_s13 = scalar_lea.sflag (!%p2147_p5), [#allocation3], %s408_s21 }
  0x4d   : > { %s2250_s28 = scalar_lea.vmem (!%p2147_p5), [#allocation2], %s1512_s11 }
  0x50   : > { %2015 = dma.done.wait (%p2140_p4), %s409_s13, 2048  }
  0x51   : > { %2017 = vsyncadd (%p2140_p4), %s409_s13, 4294965248  ;;  %s418_s0 = sand.u32 1, %s2132_s17   ;;  %s1513_s19 = sshll.u32 %s408_s21, 6 }
  0x52   : > { %s419_s25 = scalar_lea.sflag [#allocation5], %s418_s0  ;;  %s2257_s23 = scalar_lea.vmem [#allocation4], %s1513_s19 }
  0x53   : > { %2019 = dma.done.wait (%p2140_p4), %s419_s25, 1024  }
  0x54   : > { %2021 = vsyncadd (%p2140_p4), %s419_s25, 4294966272 }
  0x55   : > { %2023 = dma.done.wait (%p49_p1), [#allocation5], 1024  }
  0x56   : > { %2025 = vsyncadd (%p49_p1), [#allocation5], 4294966272 }
  0x57   : > { %2027 = dma.done.wait (%p49_p1), [#allocation8], 2048  }
  0x58   : > { %2029 = vsyncadd (%p49_p1), [#allocation8], 4294965248 }
  0x59   : > { %2031 = dma.done.wait (%p49_p1), [#allocation11], 1024  }
  0x5a   : > { %2033 = vsyncadd (%p49_p1), [#allocation11], 4294966272  ;;  %v1700_v0 = vld [vmem:[#allocation6 + $0x38] sm:$0xff]  ;;  %v1699_v1 = vld [vmem:[#allocation6 + $0x30] sm:$0xff]  ;;  %p485_p1 = scmp.lt.s32.totalorder %s2132_s17, 7 }
  0x5b   : > { %634 = vmatpush.bf16.msra.mxu0 %v1700_v0  ;;  %v1698_v2 = vld [vmem:[#allocation6 + $0x28] sm:$0xff]  ;;  %v1697_v3 = vld [vmem:[#allocation6 + $0x20] sm:$0xff]  ;;  %v1696_v4 = vld [vmem:[#allocation6 + $0x18] sm:$0xff] }
  0x5c   : > { %v1695_v5 = vld [vmem:[#allocation6 + $0x10] sm:$0xff]  ;;  %v1694_v6 = vld [vmem:[#allocation6 + $0x8] sm:$0xff]  ;;  %v1693_v7 = vld [vmem:[#allocation6] sm:$0xff]  ;;  %s2481_s17 = smov (!%p485_p1, %s2132_s17), 7 }
  0x5d   : > { %v1685_v8 = vld [vmem:[%s2257_s23] sm:$0xff]  ;;  %v1686_v9 = vld [vmem:[%s2257_s23 + $0x8] sm:$0xff]  ;;  %v1687_v10 = vld [vmem:[%s2257_s23 + $0x10] sm:$0xff]  ;;  %s1684_s27 = sshll.u32 %s2481_s17, 7 }
  0x5e   : > { %v1688_v11 = vld [vmem:[%s2257_s23 + $0x18] sm:$0xff]  ;;  %v1689_v12 = vld [vmem:[%s2257_s23 + $0x20] sm:$0xff]  ;;  %v1690_v13 = vld [vmem:[%s2257_s23 + $0x28] sm:$0xff]  ;;  %s2412_s20 = scalar_lea.vmem %s2453_s10, %s1684_s27 }
  0x5f   : > { %635 = vmatpush.bf16.msra.mxu0 %v1699_v1  ;;  %v1691_v14 = vld [vmem:[%s2257_s23 + $0x30] sm:$0xff]  ;;  %v1692_v15 = vld [vmem:[%s2257_s23 + $0x38] sm:$0xff]  ;;  %v2284_v32 = vld [vmem:[%s2250_s28] sm:$0xff] }
  0x60   : > { %v2288_v33 = vld [vmem:[%s2250_s28 + $0x8] sm:$0xff]  ;;  %v2292_v34 = vld [vmem:[%s2250_s28 + $0x10] sm:$0xff]  ;;  %v2296_v35 = vld [vmem:[%s2250_s28 + $0x18] sm:$0xff] }
  0x61   : > { %v2300_v36 = vld [vmem:[%s2250_s28 + $0x20] sm:$0xff]  ;;  %v2304_v37 = vld [vmem:[%s2250_s28 + $0x28] sm:$0xff]  ;;  %v2308_v38 = vld [vmem:[%s2250_s28 + $0x30] sm:$0xff] }
  0x62   : > { %v2312_v39 = vld [vmem:[%s2250_s28 + $0x38] sm:$0xff]  ;;  %v2316_v40 = vld [vmem:[%s2250_s28 + $0x40] sm:$0xff]  ;;  %v2320_v41 = vld [vmem:[%s2250_s28 + $0x48] sm:$0xff] }
  0x63   : > { %636 = vmatpush.bf16.msra.mxu0 %v1698_v2  ;;  %v1708_v42 = vld [vmem:[#allocation7 + $0x38] sm:$0xff]  ;;  %v2324_v43 = vld [vmem:[%s2250_s28 + $0x50] sm:$0xff]  ;;  %v1706_v45 = vld [vmem:[#allocation7 + $0x28] sm:$0xff] }
  0x64   : > { %840 = vmatpush.bf16.msra.mxu2 %v1708_v42  ;;  %v1707_v44 = vld [vmem:[#allocation7 + $0x30] sm:$0xff]  ;;  %v2328_v46 = vld [vmem:[%s2250_s28 + $0x58] sm:$0xff]  ;;  %v1705_v47 = vld [vmem:[#allocation7 + $0x20] sm:$0xff] }
  0x65   : > { %v1704_v48 = vld [vmem:[#allocation7 + $0x18] sm:$0xff]  ;;  %v2332_v49 = vld [vmem:[%s2250_s28 + $0x60] sm:$0xff]  ;;  %v1703_v50 = vld [vmem:[#allocation7 + $0x10] sm:$0xff] }
  0x66   : > { %v1702_v51 = vld [vmem:[#allocation7 + $0x8] sm:$0xff]  ;;  %v1701_v53 = vld [vmem:[#allocation7] sm:$0xff]  ;;  %v2340_v54 = vld [vmem:[%s2250_s28 + $0x70] sm:$0xff] }
  0x67   : > { %637 = vmatpush.bf16.msra.mxu0 %v1697_v3  ;;  %v2336_v52 = vld [vmem:[%s2250_s28 + $0x68] sm:$0xff]  ;;  %v2344_v55 = vld [vmem:[%s2250_s28 + $0x78] sm:$0xff]  ;;  %v1814_v57 = vld [vmem:[%s2446_s3] ss:$0 sm:$0xff] }
  0x68   : > { %841 = vmatpush.bf16.msra.mxu2 %v1707_v44 }
  0x6b   : > { %638 = vmatpush.bf16.msra.mxu0 %v1696_v4 }
  0x6c   : > { %842 = vmatpush.bf16.msra.mxu2 %v1706_v45 }
  0x6f   : > { %639 = vmatpush.bf16.msra.mxu0 %v1695_v5 }
  0x70   : > { %843 = vmatpush.bf16.msra.mxu2 %v1705_v47 }
  0x73   : > { %640 = vmatpush.bf16.msra.mxu0 %v1694_v6 }
  0x74   : > { %844 = vmatpush.bf16.msra.mxu2 %v1704_v48 }
  0x77   : > { %641 = vmatpush.bf16.msra.mxu0 %v1693_v7 }
  0x78   : > { %845 = vmatpush.bf16.msra.mxu2 %v1703_v50 }
  0x7a   : > { %642 = vmatmul.bf16.vlgmr.msra.gmra.mxu0 %v1685_v8 }
  0x7c   : > { %846 = vmatpush.bf16.msra.mxu2 %v1702_v51 }
  0x80   : > { %847 = vmatpush.bf16.msra.mxu2 %v1701_v53 }
  0x8a   : > { %647 = vmatmul.bf16.gmra.mxu0 %v1686_v9 }
  0x9a   : > { %652 = vmatmul.bf16.gmra.mxu0 %v1687_v10 }
  0xaa   : > { %657 = vmatmul.bf16.gmra.mxu0 %v1688_v11 }
  0xba   : > { %662 = vmatmul.bf16.gmra.mxu0 %v1689_v12 }
  0xca   : > { %667 = vmatmul.bf16.gmra.mxu0 %v1690_v13 }
  0xda   : > { %672 = vmatmul.bf16.gmra.mxu0 %v1691_v14 }
  0xea   : > { %677 = vmatmul.bf16.gmra.mxu0 %v1692_v15 }
  0xf7   : > { %v643_v16 = vpop.f32.mrf.mxu0 }
  0xff   : > { %v645_v17 = vpop.f32.mrf.mxu0 }
 0x107   : > { %v648_v18 = vpop.f32.mrf.mxu0 }
 0x10f   : > { %v650_v19 = vpop.f32.mrf.mxu0 }
 0x117   : > { %v653_v20 = vpop.f32.mrf.mxu0 }
 0x11f   : > { %v655_v21 = vpop.f32.mrf.mxu0 }
 0x127   : > { %v658_v22 = vpop.f32.mrf.mxu0 }
 0x12f   : > { %v660_v23 = vpop.f32.mrf.mxu0 }
 0x137   : > { %v663_v24 = vpop.f32.mrf.mxu0 }
 0x13f   : > { %v665_v25 = vpop.f32.mrf.mxu0 }
 0x147   : > { %v668_v26 = vpop.f32.mrf.mxu0 }
 0x14f   : > { %v670_v27 = vpop.f32.mrf.mxu0 }
 0x157   : > { %v673_v28 = vpop.f32.mrf.mxu0 }
 0x15f   : > { %v675_v29 = vpop.f32.mrf.mxu0 }
 0x167   : > { %v678_v30 = vpop.f32.mrf.mxu0 }
 0x16f   : > { %v680_v31 = vpop.f32.mrf.mxu0 }
 0x170   : > { %687 = vmatpush.msra.mxu1 %v680_v31 }
 0x172   : > { %688 = vmatpush.msra.mxu1 %v678_v30 }
 0x174   : > { %689 = vmatpush.msra.mxu1 %v675_v29 }
 0x176   : > { %690 = vmatpush.msra.mxu1 %v673_v28 }
 0x178   : > { %691 = vmatpush.msra.mxu1 %v670_v27 }
 0x17a   : > { %692 = vmatpush.msra.mxu1 %v668_v26 }
 0x17c   : > { %693 = vmatpush.msra.mxu1 %v665_v25 }
 0x17e   : > { %694 = vmatpush.msra.mxu1 %v663_v24 }
 0x180   : > { %695 = vmatpush.msra.mxu1 %v660_v23 }
 0x182   : > { %696 = vmatpush.msra.mxu1 %v658_v22 }
 0x184   : > { %697 = vmatpush.msra.mxu1 %v655_v21 }
 0x186   : > { %698 = vmatpush.msra.mxu1 %v653_v20 }
 0x188   : > { %699 = vmatpush.msra.mxu1 %v650_v19 }
 0x18a   : > { %700 = vmatpush.msra.mxu1 %v648_v18 }
 0x18c   : > { %701 = vmatpush.msra.mxu1 %v645_v17 }
 0x18e   : > { %702 = vmatpush.msra.mxu1 %v643_v16 }
 0x18f   : > { %703 = vmatmul.f32.vlgmr.msra.gmra.mxu1 %v2284_v32 }
 0x197   : > { %706 = vmatmul.f32.gmra.mxu1 %v2288_v33 }
 0x19f   : > { %709 = vmatmul.f32.gmra.mxu1 %v2292_v34 }
 0x1a7   : > { %712 = vmatmul.f32.gmra.mxu1 %v2296_v35 }
 0x1af   : > { %715 = vmatmul.f32.gmra.mxu1 %v2300_v36 }
 0x1b7   : > { %718 = vmatmul.f32.gmra.mxu1 %v2304_v37 }
 0x1bf   : > { %721 = vmatmul.f32.gmra.mxu1 %v2308_v38 }
 0x1c7   : > { %724 = vmatmul.f32.gmra.mxu1 %v2312_v39 }
 0x1cf   : > { %727 = vmatmul.f32.gmra.mxu1 %v2316_v40 }
 0x1d7   : > { %730 = vmatmul.f32.gmra.mxu1 %v2320_v41 }
 0x1df   : > { %733 = vmatmul.f32.gmra.mxu1 %v2324_v43 }
 0x1e7   : > { %736 = vmatmul.f32.gmra.mxu1 %v2328_v46 }
 0x1ef   : > { %739 = vmatmul.f32.gmra.mxu1 %v2332_v49 }
 0x1f7   : > { %742 = vmatmul.f32.gmra.mxu1 %v2336_v52 }
 0x1ff   : > { %745 = vmatmul.f32.gmra.mxu1 %v2340_v54 }
 0x207   : > { %748 = vmatmul.f32.gmra.mxu1 %v2344_v55 }
 0x20c   : > { %v704_v56 = vpop.f32.mrf.mxu1 }
 0x20d   : > { %v705_v58 = vadd.f32 %v1814_v57, %v704_v56 }
 0x20f   : > { %v752_v61 = vmax.f32 %v705_v58, 0.0 }
 0x214   : > { %v707_v59 = vpop.f32.mrf.mxu1 }
 0x215   : > { %v708_v60 = vadd.f32 %v1814_v57, %v707_v59 }
 0x217   : > { %v753_v62 = vmax.f32 %v708_v60, 0.0 }
 0x219   : > { %v768_v63 = vpack.c.bf16 %v753_v62, %v752_v61 }
 0x21b   : > { %848 = vmatmul.bf16.vlgmr.msra.gmra.mxu2 %v768_v63 }
 0x21c   : > { %v710_v0 = vpop.f32.mrf.mxu1 }
 0x21d   : > { %v711_v1 = vadd.f32 %v1814_v57, %v710_v0 }
 0x21f   : > { %v754_v4 = vmax.f32 %v711_v1, 0.0 }
 0x224   : > { %v713_v2 = vpop.f32.mrf.mxu1 }
 0x225   : > { %v714_v3 = vadd.f32 %v1814_v57, %v713_v2 }
 0x227   : > { %v755_v5 = vmax.f32 %v714_v3, 0.0 }
 0x229   : > { %v769_v6 = vpack.c.bf16 %v755_v5, %v754_v4 }
 0x22b   : > { %853 = vmatmul.bf16.gmra.mxu2 %v769_v6 }
 0x22c   : > { %v716_v7 = vpop.f32.mrf.mxu1 }
 0x22d   : > { %v717_v8 = vadd.f32 %v1814_v57, %v716_v7 }
 0x22f   : > { %v756_v11 = vmax.f32 %v717_v8, 0.0 }
 0x234   : > { %v719_v9 = vpop.f32.mrf.mxu1 }
 0x235   : > { %v720_v10 = vadd.f32 %v1814_v57, %v719_v9 }
 0x237   : > { %v757_v12 = vmax.f32 %v720_v10, 0.0 }
 0x239   : > { %v770_v13 = vpack.c.bf16 %v757_v12, %v756_v11 }
 0x23b   : > { %858 = vmatmul.bf16.gmra.mxu2 %v770_v13 }
 0x23c   : > { %v722_v14 = vpop.f32.mrf.mxu1 }
 0x23d   : > { %v723_v15 = vadd.f32 %v1814_v57, %v722_v14 }
 0x23f   : > { %v758_v18 = vmax.f32 %v723_v15, 0.0 }
 0x244   : > { %v725_v16 = vpop.f32.mrf.mxu1 }
 0x245   : > { %v726_v17 = vadd.f32 %v1814_v57, %v725_v16 }
 0x247   : > { %v759_v19 = vmax.f32 %v726_v17, 0.0  ;;  %v1716_v17 = vld [vmem:[#allocation9 + $0x38] sm:$0xff] }
 0x248   : > { %1030 = vmatpush.bf16.msrb.mxu0 %v1716_v17 }
 0x249   : > { %v771_v20 = vpack.c.bf16 %v759_v19, %v758_v18  ;;  %v1715_v18 = vld [vmem:[#allocation9 + $0x30] sm:$0xff]  ;;  %v1714_v19 = vld [vmem:[#allocation9 + $0x28] sm:$0xff] }
 0x24b   : > { %863 = vmatmul.bf16.gmra.mxu2 %v771_v20  ;;  %v1713_v20 = vld [vmem:[#allocation9 + $0x20] sm:$0xff] }
 0x24c   : > { %v728_v21 = vpop.f32.mrf.mxu1  ;;  %1031 = vmatpush.bf16.msrb.mxu0 %v1715_v18 }
 0x24d   : > { %v729_v22 = vadd.f32 %v1814_v57, %v728_v21  ;;  %v1712_v21 = vld [vmem:[#allocation9 + $0x18] sm:$0xff] }
 0x24f   : > { %v760_v25 = vmax.f32 %v729_v22, 0.0  ;;  %v1711_v22 = vld [vmem:[#allocation9 + $0x10] sm:$0xff] }
 0x250   : > { %1032 = vmatpush.bf16.msrb.mxu0 %v1714_v19 }
 0x254   : > { %v731_v23 = vpop.f32.mrf.mxu1  ;;  %1033 = vmatpush.bf16.msrb.mxu0 %v1713_v20 }
 0x255   : > { %v732_v24 = vadd.f32 %v1814_v57, %v731_v23  ;;  %v1710_v23 = vld [vmem:[#allocation9 + $0x8] sm:$0xff] }
 0x257   : > { %v761_v26 = vmax.f32 %v732_v24, 0.0  ;;  %v1709_v24 = vld [vmem:[#allocation9] sm:$0xff] }
 0x258   : > { %1034 = vmatpush.bf16.msrb.mxu0 %v1712_v21 }
 0x259   : > { %v772_v27 = vpack.c.bf16 %v761_v26, %v760_v25  ;;  %v1815_v26 = vld [vmem:[%s2448_s5] ss:$0 sm:$0xff] }
 0x25b   : > { %868 = vmatmul.bf16.gmra.mxu2 %v772_v27 }
 0x25c   : > { %v734_v28 = vpop.f32.mrf.mxu1  ;;  %1035 = vmatpush.bf16.msrb.mxu0 %v1711_v22 }
 0x25d   : > { %v735_v29 = vadd.f32 %v1814_v57, %v734_v28 }
 0x25f   : > { %v762_v42 = vmax.f32 %v735_v29, 0.0 }
 0x260   : > { %1036 = vmatpush.bf16.msrb.mxu0 %v1710_v23 }
 0x264   : > { %v737_v30 = vpop.f32.mrf.mxu1  ;;  %1037 = vmatpush.bf16.msrb.mxu0 %v1709_v24 }
 0x265   : > { %v738_v31 = vadd.f32 %v1814_v57, %v737_v30 }
 0x267   : > { %v763_v44 = vmax.f32 %v738_v31, 0.0 }
 0x269   : > { %v773_v45 = vpack.c.bf16 %v763_v44, %v762_v42 }
 0x26b   : > { %873 = vmatmul.bf16.gmra.mxu2 %v773_v45 }
 0x26c   : > { %v740_v47 = vpop.f32.mrf.mxu1 }
 0x26d   : > { %v741_v48 = vadd.f32 %v1814_v57, %v740_v47 }
 0x26f   : > { %v764_v53 = vmax.f32 %v741_v48, 0.0 }
 0x274   : > { %v743_v50 = vpop.f32.mrf.mxu1 }
 0x275   : > { %v744_v51 = vadd.f32 %v1814_v57, %v743_v50 }
 0x277   : > { %v765_v56 = vmax.f32 %v744_v51, 0.0 }
 0x279   : > { %v774_v58 = vpack.c.bf16 %v765_v56, %v764_v53 }
 0x27b   : > { %878 = vmatmul.bf16.gmra.mxu2 %v774_v58 }
 0x27c   : > { %v746_v59 = vpop.f32.mrf.mxu1 }
 0x27d   : > { %v747_v60 = vadd.f32 %v1814_v57, %v746_v59 }
 0x27f   : > { %v766_v63 = vmax.f32 %v747_v60, 0.0 }
 0x284   : > { %v749_v61 = vpop.f32.mrf.mxu1 }
 0x285   : > { %v750_v62 = vadd.f32 %v1814_v57, %v749_v61 }
 0x287   : > { %v767_v0 = vmax.f32 %v750_v62, 0.0 }
 0x289   : > { %v775_v1 = vpack.c.bf16 %v767_v0, %v766_v63 }
 0x28b   : > { %883 = vmatmul.bf16.gmra.mxu2 %v775_v1 }
 0x29e   : > { %v849_v2 = vpop.f32.mrf.mxu2 }
 0x2a6   : > { %v851_v3 = vpop.f32.mrf.mxu2 }
 0x2ae   : > { %v854_v4 = vpop.f32.mrf.mxu2 }
 0x2b6   : > { %v856_v5 = vpop.f32.mrf.mxu2 }
 0x2be   : > { %v859_v6 = vpop.f32.mrf.mxu2 }
 0x2c6   : > { %v861_v7 = vpop.f32.mrf.mxu2 }
 0x2ce   : > { %v864_v8 = vpop.f32.mrf.mxu2 }
 0x2d6   : > { %v866_v9 = vpop.f32.mrf.mxu2 }
 0x2de   : > { %v869_v10 = vpop.f32.mrf.mxu2 }
 0x2e6   : > { %v871_v11 = vpop.f32.mrf.mxu2 }
 0x2ee   : > { %v874_v12 = vpop.f32.mrf.mxu2 }
 0x2f6   : > { %v876_v13 = vpop.f32.mrf.mxu2 }
 0x2fe   : > { %v879_v14 = vpop.f32.mrf.mxu2 }
 0x306   : > { %v881_v15 = vpop.f32.mrf.mxu2 }
 0x30e   : > { %v884_v16 = vpop.f32.mrf.mxu2 }
 0x316   : > { %v886_v57 = vpop.f32.mrf.mxu2 }
 0x317   : > { %893 = vmatpush.msra.mxu3 %v886_v57 }
 0x319   : > { %894 = vmatpush.msra.mxu3 %v884_v16 }
 0x31b   : > { %895 = vmatpush.msra.mxu3 %v881_v15 }
 0x31d   : > { %896 = vmatpush.msra.mxu3 %v879_v14 }
 0x31f   : > { %897 = vmatpush.msra.mxu3 %v876_v13 }
 0x321   : > { %898 = vmatpush.msra.mxu3 %v874_v12 }
 0x323   : > { %899 = vmatpush.msra.mxu3 %v871_v11 }
 0x325   : > { %900 = vmatpush.msra.mxu3 %v869_v10 }
 0x327   : > { %901 = vmatpush.msra.mxu3 %v866_v9 }
 0x329   : > { %902 = vmatpush.msra.mxu3 %v864_v8 }
 0x32b   : > { %903 = vmatpush.msra.mxu3 %v861_v7 }
 0x32d   : > { %904 = vmatpush.msra.mxu3 %v859_v6 }
 0x32f   : > { %905 = vmatpush.msra.mxu3 %v856_v5 }
 0x331   : > { %906 = vmatpush.msra.mxu3 %v854_v4 }
 0x333   : > { %907 = vmatpush.msra.mxu3 %v851_v3 }
 0x335   : > { %908 = vmatpush.msra.mxu3 %v849_v2 }
 0x336   : > { %909 = vmatmul.f32.vlgmr.msra.gmra.mxu3 %v2284_v32 }
 0x33e   : > { %912 = vmatmul.f32.gmra.mxu3 %v2288_v33 }
 0x346   : > { %915 = vmatmul.f32.gmra.mxu3 %v2292_v34 }
 0x34e   : > { %918 = vmatmul.f32.gmra.mxu3 %v2296_v35 }
 0x356   : > { %921 = vmatmul.f32.gmra.mxu3 %v2300_v36 }
 0x35e   : > { %924 = vmatmul.f32.gmra.mxu3 %v2304_v37 }
 0x366   : > { %927 = vmatmul.f32.gmra.mxu3 %v2308_v38 }
 0x36e   : > { %930 = vmatmul.f32.gmra.mxu3 %v2312_v39 }
 0x376   : > { %933 = vmatmul.f32.gmra.mxu3 %v2316_v40 }
 0x37e   : > { %936 = vmatmul.f32.gmra.mxu3 %v2320_v41 }
 0x386   : > { %939 = vmatmul.f32.gmra.mxu3 %v2324_v43 }
 0x38e   : > { %942 = vmatmul.f32.gmra.mxu3 %v2328_v46 }
 0x396   : > { %945 = vmatmul.f32.gmra.mxu3 %v2332_v49 }
 0x39e   : > { %948 = vmatmul.f32.gmra.mxu3 %v2336_v52 }
 0x3a6   : > { %951 = vmatmul.f32.gmra.mxu3 %v2340_v54 }
 0x3ae   : > { %954 = vmatmul.f32.gmra.mxu3 %v2344_v55 }
 0x3b9   : > { %v910_v25 = vpop.f32.mrf.mxu3 }
 0x3ba   : > { %v911_v28 = vadd.f32 %v1815_v26, %v910_v25 }
 0x3c1   : > { %v913_v27 = vpop.f32.mrf.mxu3 }
 0x3c2   : > { %v914_v29 = vadd.f32 %v1815_v26, %v913_v27 }
 0x3c4   : > { %v958_v30 = vpack.c.bf16 %v914_v29, %v911_v28 }
 0x3c6   : > { %1038 = vmatmul.bf16.vlgmr.msrb.gmra.mxu0 %v958_v30 }
 0x3c9   : > { %v916_v31 = vpop.f32.mrf.mxu3 }
 0x3ca   : > { %v917_v44 = vadd.f32 %v1815_v26, %v916_v31 }
 0x3d1   : > { %v919_v42 = vpop.f32.mrf.mxu3 }
 0x3d2   : > { %v920_v45 = vadd.f32 %v1815_v26, %v919_v42 }
 0x3d4   : > { %v959_v47 = vpack.c.bf16 %v920_v45, %v917_v44 }
 0x3d6   : > { %1043 = vmatmul.bf16.gmra.mxu0 %v959_v47  ;;  %v1723_v47 = vld [vmem:[#allocation10 + $0x30] sm:$0xff] }
 0x3d9   : > { %v922_v48 = vpop.f32.mrf.mxu3 }
 0x3da   : > { %v923_v51 = vadd.f32 %v1815_v26, %v922_v48  ;;  %v1722_v48 = vld [vmem:[#allocation10 + $0x28] sm:$0xff] }
 0x3e1   : > { %v925_v50 = vpop.f32.mrf.mxu3 }
 0x3e2   : > { %v926_v53 = vadd.f32 %v1815_v26, %v925_v50  ;;  %v1721_v50 = vld [vmem:[#allocation10 + $0x20] sm:$0xff] }
 0x3e4   : > { %v960_v56 = vpack.c.bf16 %v926_v53, %v923_v51  ;;  %v1720_v51 = vld [vmem:[#allocation10 + $0x18] sm:$0xff]  ;;  %v1719_v53 = vld [vmem:[#allocation10 + $0x10] sm:$0xff] }
 0x3e6   : > { %1048 = vmatmul.bf16.gmra.mxu0 %v960_v56  ;;  %v1718_v56 = vld [vmem:[#allocation10 + $0x8] sm:$0xff] }
 0x3e9   : > { %v928_v58 = vpop.f32.mrf.mxu3 }
 0x3ea   : > { %v929_v60 = vadd.f32 %v1815_v26, %v928_v58  ;;  %v1717_v58 = vld [vmem:[#allocation10] sm:$0xff] }
 0x3f1   : > { %v931_v59 = vpop.f32.mrf.mxu3 }
 0x3f2   : > { %v932_v61 = vadd.f32 %v1815_v26, %v931_v59 }
 0x3f4   : > { %v961_v62 = vpack.c.bf16 %v932_v61, %v929_v60  ;;  %v1816_v60 = vld [vmem:[%s2450_s7] ss:$0 sm:$0xff] }
 0x3f6   : > { %1053 = vmatmul.bf16.gmra.mxu0 %v961_v62 }
 0x3f9   : > { %v934_v63 = vpop.f32.mrf.mxu3 }
 0x3fa   : > { %v935_v1 = vadd.f32 %v1815_v26, %v934_v63 }
 0x401   : > { %v937_v0 = vpop.f32.mrf.mxu3 }
 0x402   : > { %v938_v2 = vadd.f32 %v1815_v26, %v937_v0 }
 0x404   : > { %v962_v3 = vpack.c.bf16 %v938_v2, %v935_v1 }
 0x406   : > { %1058 = vmatmul.bf16.gmra.mxu0 %v962_v3 }
 0x409   : > { %v940_v4 = vpop.f32.mrf.mxu3 }
 0x40a   : > { %v941_v6 = vadd.f32 %v1815_v26, %v940_v4 }
 0x411   : > { %v943_v5 = vpop.f32.mrf.mxu3 }
 0x412   : > { %v944_v7 = vadd.f32 %v1815_v26, %v943_v5 }
 0x414   : > { %v963_v8 = vpack.c.bf16 %v944_v7, %v941_v6 }
 0x416   : > { %1063 = vmatmul.bf16.gmra.mxu0 %v963_v8 }
 0x419   : > { %v946_v9 = vpop.f32.mrf.mxu3 }
 0x41a   : > { %v947_v11 = vadd.f32 %v1815_v26, %v946_v9 }
 0x421   : > { %v949_v10 = vpop.f32.mrf.mxu3 }
 0x422   : > { %v950_v12 = vadd.f32 %v1815_v26, %v949_v10 }
 0x424   : > { %v964_v13 = vpack.c.bf16 %v950_v12, %v947_v11 }
 0x426   : > { %1068 = vmatmul.bf16.gmra.mxu0 %v964_v13 }
 0x429   : > { %v952_v14 = vpop.f32.mrf.mxu3 }
 0x42a   : > { %v953_v16 = vadd.f32 %v1815_v26, %v952_v14 }
 0x431   : > { %v955_v15 = vpop.f32.mrf.mxu3 }
 0x432   : > { %v956_v57 = vadd.f32 %v1815_v26, %v955_v15  ;;  %v1724_v26 = vld [vmem:[#allocation10 + $0x38] sm:$0xff] }
 0x433   : > { %1236 = vmatpush.bf16.msrb.mxu2 %v1724_v26 }
 0x434   : > { %v965_v17 = vpack.c.bf16 %v956_v57, %v953_v16 }
 0x436   : > { %1073 = vmatmul.bf16.gmra.mxu0 %v965_v17 }
 0x437   : > { %1237 = vmatpush.bf16.msrb.mxu2 %v1723_v47 }
 0x43b   : > { %1238 = vmatpush.bf16.msrb.mxu2 %v1722_v48 }
 0x43f   : > { %1239 = vmatpush.bf16.msrb.mxu2 %v1721_v50 }
 0x443   : > { %v1039_v18 = vpop.f32.mrf.mxu0  ;;  %1240 = vmatpush.bf16.msrb.mxu2 %v1720_v51 }
 0x447   : > { %1241 = vmatpush.bf16.msrb.mxu2 %v1719_v53 }
 0x44b   : > { %v1041_v19 = vpop.f32.mrf.mxu0  ;;  %1242 = vmatpush.bf16.msrb.mxu2 %v1718_v56 }
 0x44f   : > { %1243 = vmatpush.bf16.msrb.mxu2 %v1717_v58 }
 0x453   : > { %v1044_v20 = vpop.f32.mrf.mxu0 }
 0x45b   : > { %v1046_v21 = vpop.f32.mrf.mxu0 }
 0x463   : > { %v1049_v22 = vpop.f32.mrf.mxu0 }
 0x46b   : > { %v1051_v23 = vpop.f32.mrf.mxu0 }
 0x473   : > { %v1054_v24 = vpop.f32.mrf.mxu0 }
 0x47b   : > { %v1056_v25 = vpop.f32.mrf.mxu0 }
 0x483   : > { %v1059_v27 = vpop.f32.mrf.mxu0 }
 0x48b   : > { %v1061_v28 = vpop.f32.mrf.mxu0 }
 0x493   : > { %v1064_v29 = vpop.f32.mrf.mxu0 }
 0x49b   : > { %v1066_v30 = vpop.f32.mrf.mxu0 }
 0x4a3   : > { %v1069_v31 = vpop.f32.mrf.mxu0 }
 0x4ab   : > { %v1071_v42 = vpop.f32.mrf.mxu0 }
 0x4b3   : > { %v1074_v44 = vpop.f32.mrf.mxu0 }
 0x4bb   : > { %v1076_v45 = vpop.f32.mrf.mxu0 }
 0x4bc   : > { %1083 = vmatpush.msrb.mxu1 %v1076_v45 }
 0x4be   : > { %1084 = vmatpush.msrb.mxu1 %v1074_v44 }
 0x4c0   : > { %1085 = vmatpush.msrb.mxu1 %v1071_v42 }
 0x4c2   : > { %1086 = vmatpush.msrb.mxu1 %v1069_v31 }
 0x4c4   : > { %1087 = vmatpush.msrb.mxu1 %v1066_v30 }
 0x4c6   : > { %1088 = vmatpush.msrb.mxu1 %v1064_v29 }
 0x4c8   : > { %1089 = vmatpush.msrb.mxu1 %v1061_v28 }
 0x4ca   : > { %1090 = vmatpush.msrb.mxu1 %v1059_v27 }
 0x4cc   : > { %1091 = vmatpush.msrb.mxu1 %v1056_v25 }
 0x4ce   : > { %1092 = vmatpush.msrb.mxu1 %v1054_v24 }
 0x4d0   : > { %1093 = vmatpush.msrb.mxu1 %v1051_v23 }
 0x4d2   : > { %1094 = vmatpush.msrb.mxu1 %v1049_v22 }
 0x4d4   : > { %1095 = vmatpush.msrb.mxu1 %v1046_v21 }
 0x4d6   : > { %1096 = vmatpush.msrb.mxu1 %v1044_v20 }
 0x4d8   : > { %1097 = vmatpush.msrb.mxu1 %v1041_v19 }
 0x4da   : > { %1098 = vmatpush.msrb.mxu1 %v1039_v18 }
 0x4db   : > { %1099 = vmatmul.f32.vlgmr.msrb.gmra.mxu1 %v2284_v32 }
 0x4e3   : > { %1102 = vmatmul.f32.gmra.mxu1 %v2288_v33 }
 0x4eb   : > { %1105 = vmatmul.f32.gmra.mxu1 %v2292_v34 }
 0x4f3   : > { %1108 = vmatmul.f32.gmra.mxu1 %v2296_v35 }
 0x4fb   : > { %1111 = vmatmul.f32.gmra.mxu1 %v2300_v36 }
 0x503   : > { %1114 = vmatmul.f32.gmra.mxu1 %v2304_v37 }
 0x50b   : > { %1117 = vmatmul.f32.gmra.mxu1 %v2308_v38 }
 0x513   : > { %1120 = vmatmul.f32.gmra.mxu1 %v2312_v39 }
 0x51b   : > { %1123 = vmatmul.f32.gmra.mxu1 %v2316_v40 }
 0x523   : > { %1126 = vmatmul.f32.gmra.mxu1 %v2320_v41 }
 0x52b   : > { %1129 = vmatmul.f32.gmra.mxu1 %v2324_v43 }
 0x533   : > { %1132 = vmatmul.f32.gmra.mxu1 %v2328_v46 }
 0x53b   : > { %1135 = vmatmul.f32.gmra.mxu1 %v2332_v49 }
 0x543   : > { %1138 = vmatmul.f32.gmra.mxu1 %v2336_v52 }
 0x54b   : > { %1141 = vmatmul.f32.gmra.mxu1 %v2340_v54 }
 0x553   : > { %1144 = vmatmul.f32.gmra.mxu1 %v2344_v55 }
 0x558   : > { %v1100_v59 = vpop.f32.mrf.mxu1 }
 0x559   : > { %v1101_v61 = vadd.f32 %v1816_v60, %v1100_v59 }
 0x55b   : > { %v1148_v0 = vmax.f32 %v1101_v61, 0.0 }
 0x560   : > { %v1103_v62 = vpop.f32.mrf.mxu1 }
 0x561   : > { %v1104_v63 = vadd.f32 %v1816_v60, %v1103_v62 }
 0x563   : > { %v1149_v1 = vmax.f32 %v1104_v63, 0.0 }
 0x565   : > { %v1164_v2 = vpack.c.bf16 %v1149_v1, %v1148_v0 }
 0x567   : > { %1244 = vmatmul.bf16.vlgmr.msrb.gmra.mxu2 %v1164_v2 }
 0x568   : > { %v1106_v3 = vpop.f32.mrf.mxu1 }
 0x569   : > { %v1107_v4 = vadd.f32 %v1816_v60, %v1106_v3 }
 0x56b   : > { %v1150_v7 = vmax.f32 %v1107_v4, 0.0 }
 0x570   : > { %v1109_v5 = vpop.f32.mrf.mxu1 }
 0x571   : > { %v1110_v6 = vadd.f32 %v1816_v60, %v1109_v5 }
 0x573   : > { %v1151_v8 = vmax.f32 %v1110_v6, 0.0 }
 0x575   : > { %v1165_v9 = vpack.c.bf16 %v1151_v8, %v1150_v7 }
 0x577   : > { %1249 = vmatmul.bf16.gmra.mxu2 %v1165_v9 }
 0x578   : > { %v1112_v10 = vpop.f32.mrf.mxu1 }
 0x579   : > { %v1113_v11 = vadd.f32 %v1816_v60, %v1112_v10 }
 0x57b   : > { %v1152_v14 = vmax.f32 %v1113_v11, 0.0 }
 0x580   : > { %v1115_v12 = vpop.f32.mrf.mxu1 }
 0x581   : > { %v1116_v13 = vadd.f32 %v1816_v60, %v1115_v12 }
 0x583   : > { %v1153_v15 = vmax.f32 %v1116_v13, 0.0 }
 0x585   : > { %v1166_v16 = vpack.c.bf16 %v1153_v15, %v1152_v14 }
 0x587   : > { %1254 = vmatmul.bf16.gmra.mxu2 %v1166_v16 }
 0x588   : > { %v1118_v57 = vpop.f32.mrf.mxu1 }
 0x589   : > { %v1119_v17 = vadd.f32 %v1816_v60, %v1118_v57 }
 0x58b   : > { %v1154_v20 = vmax.f32 %v1119_v17, 0.0 }
 0x590   : > { %v1121_v18 = vpop.f32.mrf.mxu1 }
 0x591   : > { %v1122_v19 = vadd.f32 %v1816_v60, %v1121_v18 }
 0x593   : > { %v1155_v21 = vmax.f32 %v1122_v19, 0.0 }
 0x595   : > { %v1167_v22 = vpack.c.bf16 %v1155_v21, %v1154_v20 }
 0x597   : > { %1259 = vmatmul.bf16.gmra.mxu2 %v1167_v22 }
 0x598   : > { %v1124_v23 = vpop.f32.mrf.mxu1 }
 0x599   : > { %v1125_v24 = vadd.f32 %v1816_v60, %v1124_v23 }
 0x59b   : > { %v1156_v28 = vmax.f32 %v1125_v24, 0.0 }
 0x5a0   : > { %v1127_v25 = vpop.f32.mrf.mxu1 }
 0x5a1   : > { %v1128_v27 = vadd.f32 %v1816_v60, %v1127_v25 }
 0x5a3   : > { %v1157_v29 = vmax.f32 %v1128_v27, 0.0 }
 0x5a5   : > { %v1168_v30 = vpack.c.bf16 %v1157_v29, %v1156_v28 }
 0x5a7   : > { %1264 = vmatmul.bf16.gmra.mxu2 %v1168_v30 }
 0x5a8   : > { %v1130_v31 = vpop.f32.mrf.mxu1 }
 0x5a9   : > { %v1131_v42 = vadd.f32 %v1816_v60, %v1130_v31 }
 0x5ab   : > { %v1158_v26 = vmax.f32 %v1131_v42, 0.0 }
 0x5b0   : > { %v1133_v44 = vpop.f32.mrf.mxu1 }
 0x5b1   : > { %v1134_v45 = vadd.f32 %v1816_v60, %v1133_v44 }
 0x5b3   : > { %v1159_v47 = vmax.f32 %v1134_v45, 0.0 }
 0x5b5   : > { %v1169_v48 = vpack.c.bf16 %v1159_v47, %v1158_v26 }
 0x5b7   : > { %1269 = vmatmul.bf16.gmra.mxu2 %v1169_v48 }
 0x5b8   : > { %v1136_v50 = vpop.f32.mrf.mxu1 }
 0x5b9   : > { %v1137_v51 = vadd.f32 %v1816_v60, %v1136_v50 }
 0x5bb   : > { %v1160_v58 = vmax.f32 %v1137_v51, 0.0 }
 0x5c0   : > { %v1139_v53 = vpop.f32.mrf.mxu1 }
 0x5c1   : > { %v1140_v56 = vadd.f32 %v1816_v60, %v1139_v53 }
 0x5c3   : > { %v1161_v59 = vmax.f32 %v1140_v56, 0.0 }
 0x5c5   : > { %v1170_v61 = vpack.c.bf16 %v1161_v59, %v1160_v58 }
 0x5c7   : > { %1274 = vmatmul.bf16.gmra.mxu2 %v1170_v61 }
 0x5c8   : > { %v1142_v62 = vpop.f32.mrf.mxu1 }
 0x5c9   : > { %v1143_v63 = vadd.f32 %v1816_v60, %v1142_v62 }
 0x5cb   : > { %v1162_v2 = vmax.f32 %v1143_v63, 0.0 }
 0x5d0   : > { %v1145_v0 = vpop.f32.mrf.mxu1 }
 0x5d1   : > { %v1146_v1 = vadd.f32 %v1816_v60, %v1145_v0 }
 0x5d3   : > { %v1163_v3 = vmax.f32 %v1146_v1, 0.0 }
 0x5d5   : > { %v1171_v4 = vpack.c.bf16 %v1163_v3, %v1162_v2 }
 0x5d7   : > { %1279 = vmatmul.bf16.gmra.mxu2 %v1171_v4 }
 0x5ea   : > { %v1245_v5 = vpop.f32.mrf.mxu2 }
 0x5f2   : > { %v1247_v6 = vpop.f32.mrf.mxu2 }
 0x5fa   : > { %v1250_v7 = vpop.f32.mrf.mxu2 }
 0x602   : > { %v1252_v8 = vpop.f32.mrf.mxu2 }
 0x60a   : > { %v1255_v9 = vpop.f32.mrf.mxu2 }
 0x612   : > { %v1257_v10 = vpop.f32.mrf.mxu2 }
 0x61a   : > { %v1260_v11 = vpop.f32.mrf.mxu2 }
 0x622   : > { %v1262_v12 = vpop.f32.mrf.mxu2 }
 0x62a   : > { %v1265_v13 = vpop.f32.mrf.mxu2 }
 0x632   : > { %v1267_v14 = vpop.f32.mrf.mxu2 }
 0x63a   : > { %v1270_v15 = vpop.f32.mrf.mxu2 }
 0x642   : > { %v1272_v16 = vpop.f32.mrf.mxu2 }
 0x64a   : > { %v1275_v57 = vpop.f32.mrf.mxu2 }
 0x652   : > { %v1277_v17 = vpop.f32.mrf.mxu2 }
 0x65a   : > { %v1280_v18 = vpop.f32.mrf.mxu2 }
 0x662   : > { %v1282_v60 = vpop.f32.mrf.mxu2 }
 0x663   : > { %1289 = vmatpush.msrb.mxu3 %v1282_v60 }
 0x665   : > { %1290 = vmatpush.msrb.mxu3 %v1280_v18 }
 0x667   : > { %1291 = vmatpush.msrb.mxu3 %v1277_v17 }
 0x669   : > { %1292 = vmatpush.msrb.mxu3 %v1275_v57 }
 0x66b   : > { %1293 = vmatpush.msrb.mxu3 %v1272_v16 }
 0x66d   : > { %1294 = vmatpush.msrb.mxu3 %v1270_v15 }
 0x66f   : > { %1295 = vmatpush.msrb.mxu3 %v1267_v14 }
 0x671   : > { %1296 = vmatpush.msrb.mxu3 %v1265_v13 }
 0x673   : > { %1297 = vmatpush.msrb.mxu3 %v1262_v12 }
 0x675   : > { %1298 = vmatpush.msrb.mxu3 %v1260_v11 }
 0x677   : > { %1299 = vmatpush.msrb.mxu3 %v1257_v10 }
 0x679   : > { %1300 = vmatpush.msrb.mxu3 %v1255_v9 }
 0x67b   : > { %1301 = vmatpush.msrb.mxu3 %v1252_v8 }
 0x67d   : > { %1302 = vmatpush.msrb.mxu3 %v1250_v7 }
 0x67f   : > { %1303 = vmatpush.msrb.mxu3 %v1247_v6 }
 0x681   : > { %1304 = vmatpush.msrb.mxu3 %v1245_v5 }
 0x682   : > { %1305 = vmatmul.f32.vlgmr.msrb.gmra.mxu3 %v2284_v32  ;;  %v1817_v32 = vld [vmem:[%s2452_s9] ss:$0 sm:$0xff] }
 0x68a   : > { %1308 = vmatmul.f32.gmra.mxu3 %v2288_v33 }
 0x692   : > { %1311 = vmatmul.f32.gmra.mxu3 %v2292_v34 }
 0x69a   : > { %1314 = vmatmul.f32.gmra.mxu3 %v2296_v35 }
 0x6a2   : > { %1317 = vmatmul.f32.gmra.mxu3 %v2300_v36 }
 0x6aa   : > { %1320 = vmatmul.f32.gmra.mxu3 %v2304_v37 }
 0x6b2   : > { %1323 = vmatmul.f32.gmra.mxu3 %v2308_v38 }
 0x6ba   : > { %1326 = vmatmul.f32.gmra.mxu3 %v2312_v39 }
 0x6c2   : > { %1329 = vmatmul.f32.gmra.mxu3 %v2316_v40 }
 0x6ca   : > { %1332 = vmatmul.f32.gmra.mxu3 %v2320_v41 }
 0x6d2   : > { %1335 = vmatmul.f32.gmra.mxu3 %v2324_v43 }
 0x6da   : > { %1338 = vmatmul.f32.gmra.mxu3 %v2328_v46 }
 0x6e2   : > { %1341 = vmatmul.f32.gmra.mxu3 %v2332_v49 }
 0x6ea   : > { %1344 = vmatmul.f32.gmra.mxu3 %v2336_v52 }
 0x6f2   : > { %1347 = vmatmul.f32.gmra.mxu3 %v2340_v54 }
 0x6fa   : > { %1350 = vmatmul.f32.gmra.mxu3 %v2344_v55 }
 0x705   : > { %v1306_v33 = vpop.f32.mrf.mxu3 }
 0x706   : > { %v1307_v34 = vadd.f32 %v1817_v32, %v1306_v33 }
 0x708   : > { %1354 = vst [vmem:[%s2412_s20] sm:$0xff] %v1307_v34 }
 0x70d   : > { %v1309_v35 = vpop.f32.mrf.mxu3 }
 0x70e   : > { %v1310_v36 = vadd.f32 %v1817_v32, %v1309_v35 }
 0x710   : > { %1355 = vst [vmem:[%s2412_s20 + $0x8] sm:$0xff] %v1310_v36 }
 0x715   : > { %v1312_v37 = vpop.f32.mrf.mxu3 }
 0x716   : > { %v1313_v38 = vadd.f32 %v1817_v32, %v1312_v37 }
 0x718   : > { %1356 = vst [vmem:[%s2412_s20 + $0x10] sm:$0xff] %v1313_v38 }
 0x71d   : > { %v1315_v39 = vpop.f32.mrf.mxu3 }
 0x71e   : > { %v1316_v40 = vadd.f32 %v1817_v32, %v1315_v39 }
 0x720   : > { %1357 = vst [vmem:[%s2412_s20 + $0x18] sm:$0xff] %v1316_v40 }
 0x725   : > { %v1318_v41 = vpop.f32.mrf.mxu3 }
 0x726   : > { %v1319_v43 = vadd.f32 %v1817_v32, %v1318_v41 }
 0x728   : > { %1358 = vst [vmem:[%s2412_s20 + $0x20] sm:$0xff] %v1319_v43 }
 0x72d   : > { %v1321_v46 = vpop.f32.mrf.mxu3 }
 0x72e   : > { %v1322_v49 = vadd.f32 %v1817_v32, %v1321_v46 }
 0x730   : > { %1359 = vst [vmem:[%s2412_s20 + $0x28] sm:$0xff] %v1322_v49 }
 0x735   : > { %v1324_v52 = vpop.f32.mrf.mxu3 }
 0x736   : > { %v1325_v54 = vadd.f32 %v1817_v32, %v1324_v52 }
 0x738   : > { %1360 = vst [vmem:[%s2412_s20 + $0x30] sm:$0xff] %v1325_v54 }
 0x73d   : > { %v1327_v55 = vpop.f32.mrf.mxu3 }
 0x73e   : > { %v1328_v19 = vadd.f32 %v1817_v32, %v1327_v55 }
 0x740   : > { %1361 = vst [vmem:[%s2412_s20 + $0x38] sm:$0xff] %v1328_v19 }
 0x745   : > { %v1330_v20 = vpop.f32.mrf.mxu3 }
 0x746   : > { %v1331_v21 = vadd.f32 %v1817_v32, %v1330_v20 }
 0x748   : > { %1362 = vst [vmem:[%s2412_s20 + $0x40] sm:$0xff] %v1331_v21 }
 0x74d   : > { %v1333_v22 = vpop.f32.mrf.mxu3 }
 0x74e   : > { %v1334_v23 = vadd.f32 %v1817_v32, %v1333_v22 }
 0x750   : > { %1363 = vst [vmem:[%s2412_s20 + $0x48] sm:$0xff] %v1334_v23 }
 0x755   : > { %v1336_v24 = vpop.f32.mrf.mxu3 }
 0x756   : > { %v1337_v25 = vadd.f32 %v1817_v32, %v1336_v24 }
 0x758   : > { %1364 = vst [vmem:[%s2412_s20 + $0x50] sm:$0xff] %v1337_v25 }
 0x75d   : > { %v1339_v27 = vpop.f32.mrf.mxu3 }
 0x75e   : > { %v1340_v28 = vadd.f32 %v1817_v32, %v1339_v27 }
 0x760   : > { %1365 = vst [vmem:[%s2412_s20 + $0x58] sm:$0xff] %v1340_v28 }
 0x765   : > { %v1342_v29 = vpop.f32.mrf.mxu3 }
 0x766   : > { %v1343_v30 = vadd.f32 %v1817_v32, %v1342_v29 }
 0x768   : > { %1366 = vst [vmem:[%s2412_s20 + $0x60] sm:$0xff] %v1343_v30 }
 0x76d   : > { %v1345_v31 = vpop.f32.mrf.mxu3 }
 0x76e   : > { %v1346_v42 = vadd.f32 %v1817_v32, %v1345_v31 }
 0x770   : > { %1367 = vst [vmem:[%s2412_s20 + $0x68] sm:$0xff] %v1346_v42 }
 0x775   : > { %v1348_v44 = vpop.f32.mrf.mxu3 }
 0x776   : > { %v1349_v45 = vadd.f32 %v1817_v32, %v1348_v44 }
 0x778   : > { %1368 = vst [vmem:[%s2412_s20 + $0x70] sm:$0xff] %v1349_v45 }
 0x77d   : > { %v1351_v26 = vpop.f32.mrf.mxu3 }
 0x77e   : > { %v1352_v47 = vadd.f32 %v1817_v32, %v1351_v26 }
 0x780   : > { %1369 = vst [vmem:[%s2412_s20 + $0x78] sm:$0xff] %v1352_v47 }
 0x781 PF: > { %s2475_s17 = sld [smem:[#allocation17_spill]]  ;;  %p25_p4 = scmp.ge.s32.totalorder %s2189_s12, 10  }
 0x782   : > { %s2476_s15 = sld [smem:[#allocation18_spill]]  ;;  %s2477_s13 = smov %s2040_s14 }
 0x783   : > { %s2479_s16 = smov %s2189_s12  ;;  %27 = sbr.rel (!%p25_p4) target bundleno = 13 (0xd), region = 129 }
 0x787   : > { %s2478_s14 = smov %s2475_s17 }
 0x788   :  { %1391 = vsyncpa [#allocation3], 1 }
 0x789   :  { %1393 = vsyncpa [#allocation3 + $0x1], 1 }
 0x78a   :  { %1394 = vsyncpa [#allocation5], 1 }
 0x78b   :  { %1396 = vsyncpa [#allocation5 + $0x1], 1 }
 0x78c   :  { %1397 = vsyncpa [#allocation8], 1 }
 0x78d   :  { %1398 = vsyncpa [#allocation11], 1 }

</bundles_post_ra>
